<compile_context>
chip_gen: v7x
topology: tpu7x:2x2x1
jax: 0.10.0
libtpu: 0.0.40
codegen_flags: <defaults>
</compile_context>

<pallas_src>
import functools

import jax
import jax.numpy as jnp
from jax.experimental import pallas as pl
from jax.experimental.pallas import tpu as pltpu


_BLOCK_BUDGET = 2 * 1024 * 1024      # target bytes per streamed block (1-4 MiB sweet spot)
_FUSED_BUDGET = 16 * 1024 * 1024     # max estimated VMEM footprint for the fused path
_VMEM_CAP = 48 * 1024 * 1024         # never request more scoped VMEM than this (v7x: 64 MiB physical)
_EPS = 1e-6


# ---------------------------------------------------------------------------
# Fused path: whole activation resident in VMEM (1 HBM read + 1 HBM write).
# ---------------------------------------------------------------------------
def _fused_kernel(x_ref, y_ref, bias_ref, logs_ref, *, scale, m):
    x = x_ref[...].astype(jnp.float32)                                   # (N, C, HW)
    s = jnp.sum(jnp.sum(x, axis=2, keepdims=True), axis=0, keepdims=True)
    mean = s * jnp.float32(1.0 / m)                                      # (1, C, 1)
    d = x - mean
    ssq = jnp.sum(jnp.sum(d * d, axis=2, keepdims=True), axis=0, keepdims=True)
    var = ssq * jnp.float32(1.0 / max(m - 1, 1))                         # unbiased (torch.std)
    std = jnp.sqrt(var)
    logs = jnp.log(jnp.float32(scale) / (std + jnp.float32(_EPS)))       # (1, C, 1)
    y_ref[...] = (d * jnp.exp(logs)).astype(y_ref.dtype)
    bias_ref[...] = -mean
    logs_ref[...] = logs


# ---------------------------------------------------------------------------
# Streaming path kernels.
# ---------------------------------------------------------------------------
def _stats_kernel(x_ref, psum_ref, psq_ref):
    """One grid step = one (row-block, hw-tile) block.  Accumulates per-row
    sum(x) / sum(x*x) into resident (Rb, 1) outputs (index map ignores t)."""
    @pl.when(pl.program_id(1) == 0)
    def _init():
        psum_ref[...] = jnp.zeros_like(psum_ref)
        psq_ref[...] = jnp.zeros_like(psq_ref)

    x = x_ref[...].astype(jnp.float32)                                   # (Rb, T)
    psum_ref[...] += jnp.sum(x, axis=1, keepdims=True)
    psq_ref[...] += jnp.sum(x * x, axis=1, keepdims=True)


def _normalize_kernel(params_ref, x_ref, y_ref):
    """y = (x + bias) * gain, bias/gain packed in one resident (Rb, 2) block."""
    p = params_ref[...]                                                  # (Rb, 2) f32
    bias = p[:, 0:1]
    gain = p[:, 1:2]
    x = x_ref[...].astype(jnp.float32)
    y_ref[...] = ((x + bias) * gain).astype(y_ref.dtype)


# ---------------------------------------------------------------------------
# Tiling plan helpers.
# ---------------------------------------------------------------------------
def _choose_row_block(rows, max_rb=256):
    """Row (sublane) block: multiple-of-8 divisor of `rows`, as large as possible
    but <= max_rb, preferring >= 2 blocks (parallel axis for v7x megacore).
    Falls back to the full extent, which is always a legal block dim."""
    if rows % 8 == 0:
        best = None
        rb = 8
        while rb <= min(rows // 2, max_rb):
            if rows % rb == 0:
                best = rb
            rb += 8
        if best is not None:
            return best
        if rows <= max_rb:
            return rows
    return rows


def _plan_lane_tiling(hw, rb, itemsize, budget=_BLOCK_BUDGET):
    """Return (hw_pad, T): lane padding and lane-tile width sized by a byte budget."""
    t_budget = max(128, (budget // max(1, rb * itemsize)) // 128 * 128)
    if hw % 128 == 0:
        hw_pad = hw
    elif rb * hw * itemsize <= budget:
        return hw, hw                       # single full-extent lane block; no padding needed
    else:
        hw_pad = ((hw + 127) // 128) * 128
    if t_budget >= hw_pad:
        return hw_pad, hw_pad
    best = 128
    t = 256
    while t <= t_budget:
        if hw_pad % t == 0:
            best = t
        t += 128
    return hw_pad, best


def _clamp_vmem(nbytes):
    return int(min(max(nbytes, 4 * 1024 * 1024), _VMEM_CAP))


# ---------------------------------------------------------------------------
# Public wrapper.
# ---------------------------------------------------------------------------
def actnorm2d_forward(x, scale=1.0, logdet=None, force_streaming=False):
    """ActNorm2D forward (data-dependent init path, reverse=False).

    Returns (y, bias, logs) or (y, logdet + dlogdet, bias, logs), with
    bias/logs shaped (1, C, 1, 1) like the PyTorch parameters.
    """
    if x.ndim != 4:
        raise ValueError("expected 4D input (got {}D input)".format(x.ndim))
    N, C, H, W = x.shape
    HW = H * W
    M = N * HW
    itemsize = jnp.dtype(x.dtype).itemsize

    # Footprint estimate for the fused path: in block + out block + ~3 f32 temps.
    fused_bytes = N * C * HW * (2 * itemsize + 12) + 64 * 1024
    use_fused = (not force_streaming) and (fused_bytes <= _FUSED_BUDGET)

    if use_fused:
        x3 = x.reshape(N, C, HW)                                         # free reshape
        y3, bias_o, logs_o = pl.pallas_call(
            functools.partial(_fused_kernel, scale=float(scale), m=M),
            out_shape=(
                jax.ShapeDtypeStruct((N, C, HW), x.dtype),
                jax.ShapeDtypeStruct((1, C, 1), jnp.float32),
                jax.ShapeDtypeStruct((1, C, 1), jnp.float32),
            ),
            compiler_params=pltpu.CompilerParams(
                vmem_limit_bytes=_clamp_vmem(fused_bytes + (16 << 20))),
        )(x3)
        y = y3.reshape(N, C, H, W)
        bias_c = bias_o.reshape(C)
        logs_c = logs_o.reshape(C)
    else:
        R = N * C
        Rb = _choose_row_block(R)
        hw_pad, T = _plan_lane_tiling(HW, Rb, itemsize)
        n_row_blocks = R // Rb
        n_hw_tiles = hw_pad // T

        x2 = x.reshape(R, HW)                                            # free reshape
        if hw_pad != HW:
            # Zero padding is exact for the sums and sliced off after phase 2.
            # TODO(synk): in-kernel lane masking would avoid this extra HBM copy.
            x2 = jnp.pad(x2, ((0, 0), (0, hw_pad - HW)))

        in_block = Rb * T * itemsize

        # -------- phase 1: per-row sum / sum-of-squares (one read of x) -----
        psum, psq = pl.pallas_call(
            _stats_kernel,
            grid=(n_row_blocks, n_hw_tiles),
            in_specs=[pl.BlockSpec((Rb, T), lambda r, t: (r, t))],
            out_specs=(
                pl.BlockSpec((Rb, 1), lambda r, t: (r, 0)),
                pl.BlockSpec((Rb, 1), lambda r, t: (r, 0)),
            ),
            out_shape=(
                jax.ShapeDtypeStruct((R, 1), jnp.float32),
                jax.ShapeDtypeStruct((R, 1), jnp.float32),
            ),
            compiler_params=pltpu.CompilerParams(
                dimension_semantics=("parallel", "arbitrary"),
                vmem_limit_bytes=_clamp_vmem(2 * in_block + (8 << 20))),
        )(x2)

        # -------- tiny per-channel parameter math: plain JAX ----------------
        total_sum = jnp.sum(psum.reshape(N, C), axis=0)                  # (C,)
        total_sq = jnp.sum(psq.reshape(N, C), axis=0)
        mean = total_sum / jnp.float32(M)
        # One-pass unbiased variance (torch.std default).  Per-(n,c) partials keep
        # the accumulators short; clamp tiny negative cancellation residue.
        # TODO(synk): a Welford/two-pass streaming variance would track torch even
        # more tightly when |mean| >> std at very large M.
        var = (total_sq - total_sum * mean) / jnp.float32(max(M - 1, 1))
        std = jnp.sqrt(jnp.maximum(var, 0.0))
        logs_c = jnp.log(jnp.float32(scale) / (std + jnp.float32(_EPS)))
        bias_c = -mean
        gain_c = jnp.exp(logs_c)

        # Pack per-row (bias, gain) into one resident (R, 2) block.
        params = jnp.stack(
            [jnp.tile(bias_c, N), jnp.tile(gain_c, N)], axis=1
        ).astype(jnp.float32)

        # -------- phase 2: y = (x + bias) * exp(logs), streamed -------------
        y2 = pl.pallas_call(
            _normalize_kernel,
            grid=(n_row_blocks, n_hw_tiles),
            in_specs=[
                pl.BlockSpec((Rb, 2), lambda r, t: (r, 0)),   # packed bias/gain, resident over t
                pl.BlockSpec((Rb, T), lambda r, t: (r, t)),
            ],
            out_specs=pl.BlockSpec((Rb, T), lambda r, t: (r, t)),
            out_shape=jax.ShapeDtypeStruct((R, hw_pad), x.dtype),
            compiler_params=pltpu.CompilerParams(
                dimension_semantics=("parallel", "parallel"),
                vmem_limit_bytes=_clamp_vmem(4 * in_block + (8 << 20))),
        )(params, x2)

        if hw_pad != HW:
            y2 = y2[:, :HW]
        y = y2.reshape(N, C, H, W)

    bias4 = bias_c.reshape(1, C, 1, 1)
    logs4 = logs_c.reshape(1, C, 1, 1)

    # TODO(synk): reverse=True path (x * exp(-logs) - bias, logdet_factor *= -1)
    # and the module's stateful `initialized` flag are not implemented; this is
    # the data-dependent-init forward pass only.
    if logdet is not None:
        dlogdet = jnp.sum(logs_c) * jnp.float32(H * W)
        return y, logdet + dlogdet, bias4, logs4
    return y, bias4, logs4


# ---------------------------------------------------------------------------
# Self-test.
# ---------------------------------------------------------------------------
if __name__ == "__main__":
    key = jax.random.PRNGKey(0)

    def _ref(x, scale, logdet=None):
        x32 = x.astype(jnp.float32)
        n, c, h, w = x.shape
        m = n * h * w
        mean = jnp.mean(x32, axis=(0, 2, 3), keepdims=True)
        std = jnp.sqrt(jnp.sum((x32 - mean) ** 2, axis=(0, 2, 3), keepdims=True)
                       / max(m - 1, 1))
        logs = jnp.log(scale / (std + _EPS))
        bias = -mean
        y = (x32 + bias) * jnp.exp(logs)
        if logdet is not None:
            return y, logdet + jnp.sum(logs) * (h * w), bias, logs
        return y, bias, logs

    tests = [
        ((2, 4, 16, 16), False, False),   # fused path
        ((2, 4, 16, 16), False, True),    # fused path + logdet
        ((2, 4, 16, 16), True, True),     # streaming path forced
        ((2, 3, 10, 10), True, False),    # non-128-aligned spatial, streaming
    ]
    for idx, (shape, force_stream, with_logdet) in enumerate(tests):
        k = jax.random.fold_in(key, idx)
        x = jax.random.normal(k, shape, dtype=jnp.float32) * 2.0 + 0.5
        logdet0 = jnp.float32(0.1) if with_logdet else None
        out = actnorm2d_forward(x, scale=1.0, logdet=logdet0,
                                force_streaming=force_stream)
        out = jax.block_until_ready(out)
        ref = _ref(x, 1.0, logdet0)
        if with_logdet:
            y, ld, bias, logs = out
            ry, rld, rbias, rlogs = ref
            assert jnp.allclose(ld, rld, atol=1e-4, rtol=1e-4), f"logdet mismatch {shape}"
        else:
            y, bias, logs = out
            ry, rbias, rlogs = ref
        assert jnp.allclose(y, ry, atol=1e-4, rtol=1e-4), f"y mismatch {shape}"
        assert jnp.allclose(bias, rbias, atol=1e-4, rtol=1e-4), f"bias mismatch {shape}"
        assert jnp.allclose(logs, rlogs, atol=1e-4, rtol=1e-4), f"logs mismatch {shape}"

    print("KERNEL_OK")
</pallas_src>

<mosaic_0001>
module attributes {stable_mosaic.version = 11 : i64} {
  func.func @_fused_kernel(%arg0: memref<2x4x256xf32, #tpu.memory_space<vmem>>, %arg1: memref<2x4x256xf32, #tpu.memory_space<vmem>>, %arg2: memref<1x4x1xf32, #tpu.memory_space<vmem>>, %arg3: memref<1x4x1xf32, #tpu.memory_space<vmem>>) attributes {dimension_semantics = [], scalar_prefetch = 0 : i64, scratch_operands = 0 : i64, tpu.core_type = #tpu.core_type<tc>} {
    %c0 = arith.constant 0 : index
    %c0_0 = arith.constant 0 : index
    %c0_1 = arith.constant 0 : index
    %0 = vector.load %arg0[%c0, %c0_0, %c0_1] : memref<2x4x256xf32, #tpu.memory_space<vmem>>, vector<2x4x256xf32>
    %cst = arith.constant dense<0.000000e+00> : vector<2x4xf32>
    %1 = vector.multi_reduction <add>, %0, %cst [2] : vector<2x4x256xf32> to vector<2x4xf32>
    %2 = vector.shape_cast %1 : vector<2x4xf32> to vector<2x4x1xf32>
    %cst_2 = arith.constant dense<0.000000e+00> : vector<4x1xf32>
    %3 = vector.multi_reduction <add>, %2, %cst_2 [0] : vector<2x4x1xf32> to vector<4x1xf32>
    %4 = vector.shape_cast %3 : vector<4x1xf32> to vector<1x4x1xf32>
    %cst_3 = arith.constant 0.001953125 : f32
    %5 = vector.broadcast %cst_3 : f32 to vector<1x4x1xf32>
    %6 = arith.mulf %4, %5 : vector<1x4x1xf32>
    %7 = vector.broadcast %6 : vector<1x4x1xf32> to vector<2x4x256xf32>
    %8 = arith.subf %0, %7 : vector<2x4x256xf32>
    %9 = arith.mulf %8, %8 : vector<2x4x256xf32>
    %cst_4 = arith.constant dense<0.000000e+00> : vector<2x4xf32>
    %10 = vector.multi_reduction <add>, %9, %cst_4 [2] : vector<2x4x256xf32> to vector<2x4xf32>
    %11 = vector.shape_cast %10 : vector<2x4xf32> to vector<2x4x1xf32>
    %cst_5 = arith.constant dense<0.000000e+00> : vector<4x1xf32>
    %12 = vector.multi_reduction <add>, %11, %cst_5 [0] : vector<2x4x1xf32> to vector<4x1xf32>
    %13 = vector.shape_cast %12 : vector<4x1xf32> to vector<1x4x1xf32>
    %cst_6 = arith.constant 0.00195694715 : f32
    %14 = vector.broadcast %cst_6 : f32 to vector<1x4x1xf32>
    %15 = arith.mulf %13, %14 : vector<1x4x1xf32>
    %16 = math.sqrt %15 : vector<1x4x1xf32>
    %cst_7 = arith.constant 9.99999997E-7 : f32
    %17 = vector.broadcast %cst_7 : f32 to vector<1x4x1xf32>
    %18 = arith.addf %16, %17 : vector<1x4x1xf32>
    %cst_8 = arith.constant 1.000000e+00 : f32
    %19 = vector.broadcast %cst_8 : f32 to vector<1x4x1xf32>
    %20 = arith.divf %19, %18 : vector<1x4x1xf32>
    %21 = math.log %20 : vector<1x4x1xf32>
    %22 = math.exp %21 : vector<1x4x1xf32>
    %23 = vector.broadcast %22 : vector<1x4x1xf32> to vector<2x4x256xf32>
    %24 = arith.mulf %8, %23 : vector<2x4x256xf32>
    %c0_9 = arith.constant 0 : index
    %c0_10 = arith.constant 0 : index
    %c0_11 = arith.constant 0 : index
    %25 = vector.load %arg1[%c0_9, %c0_10, %c0_11] : memref<2x4x256xf32, #tpu.memory_space<vmem>>, vector<2x4x256xf32>
    tpu.vector_store %arg1[%c0_9, %c0_10, %c0_11], %24 {strides = array<i32>} : memref<2x4x256xf32, #tpu.memory_space<vmem>>, vector<2x4x256xf32>,
    %cst_12 = arith.constant 0.000000e+00 : f32
    %26 = vector.broadcast %cst_12 : f32 to vector<1x4x1xf32>
    %27 = arith.subf %26, %6 : vector<1x4x1xf32>
    %c0_13 = arith.constant 0 : index
    %c0_14 = arith.constant 0 : index
    %c0_15 = arith.constant 0 : index
    %28 = vector.load %arg2[%c0_13, %c0_14, %c0_15] : memref<1x4x1xf32, #tpu.memory_space<vmem>>, vector<1x4x1xf32>
    tpu.vector_store %arg2[%c0_13, %c0_14, %c0_15], %27 {strides = array<i32>} : memref<1x4x1xf32, #tpu.memory_space<vmem>>, vector<1x4x1xf32>,
    %c0_16 = arith.constant 0 : index
    %c0_17 = arith.constant 0 : index
    %c0_18 = arith.constant 0 : index
    %29 = vector.load %arg3[%c0_16, %c0_17, %c0_18] : memref<1x4x1xf32, #tpu.memory_space<vmem>>, vector<1x4x1xf32>
    tpu.vector_store %arg3[%c0_16, %c0_17, %c0_18], %21 {strides = array<i32>} : memref<1x4x1xf32, #tpu.memory_space<vmem>>, vector<1x4x1xf32>,
    return
  }
}

</mosaic_0001>

<bundles_post_ra>
// kernel: tpu_custom_call.1
= control target key start
LH: loop header
LB: loop body
LE: loop exit
PB: predicated region body
PF: predicated region fallthrough
CT: control target
= control target key end

     0   :  { %9 = vsyncpa [#allocation3], 0  ;;  %s276_s0 = inlined_call_operand.hbm [shape: f32[2,4,256], index: 0, kind: input, shape index: {}]   ;;  %s277_s1 = inlined_call_operand.hbm [shape: f32[2,4,256], index: 1, kind: output, shape index: {0}]   ;;  %s278_s2 = inlined_call_operand.vmem [shape: f32[1,4,1], index: 2, kind: output, shape index: {1}]   ;;  %s279_s3 = inlined_call_operand.vmem [shape: f32[1,4,1], index: 3, kind: output, shape index: {2}]  }
   0x1   :  { %10 = vsyncpa [#allocation4], 0  ;;  %s201_s12 = smov [#allocation2]   ;;  %s153_s16 = scalar_lea.hbm %s276_s0, 256 }
   0x2   :  { %s16_s13 = sshll.u32 %s201_s12, 4  ;;  %p154_p0 = scmp.ne.s32.totalorder %s276_s0, %s153_s16  ;;  %s17_s13 = int_to_ptr.vmem [resolvable:$true] %s16_s13 }
   0x3   :  { %p157_p1 = scmp.lt.u32.totalorder %s153_s16, %s276_s0 }
   0x5   :  { %p159_p2 = pnand %p157_p1, %p154_p0 }
   0x7   :  { %162 = shalt.err (!%p159_p2)
}
   0x8   :  { %s163_s21 = scalar_lea.vmem %s17_s13, 256  ;;  %p168_p4 = scmp.lt.s32.totalorder %s17_s13, %s17_s13 }
   0x9   :  { %p164_p3 = scmp.ne.s32.totalorder %s17_s13, %s163_s21  ;;  %p169_p5 = scmp.lt.s32.totalorder %s163_s21, %s163_s21 }
   0xb   :  { %p170_p6 = por %p169_p5, %p168_p4 }
   0xd   :  { %p171_p7 = pnand %p170_p6, %p164_p3 }
   0xf   :  { %174 = shalt.err (!%p171_p7)
}
  0x10   :  { %s202_s22 = smov 128   ;;  %s203_s23 = smov 8  }
  0x11   :  { %22 = dma.hbm_to_vmem [thread:$0]  %s276_s0, 256, %s17_s13, [#allocation3], %s202_s22, %s202_s22, %s203_s23  }
  0x12   :  { %197 = dma.done.wait [#allocation3], 256  }
  0x13   :  { %198 = vsyncadd [#allocation3], 4294967040  ;;  %vm34_vm0 = vcmask 1043456   ;;  %v26_v0 = vld [vmem:[#allocation2] sm:$0xff]  ;;  %v27_v1 = vld [vmem:[#allocation2 + $0x8] sm:$0xff]  ;;  %v53_v12 = vlaneseq  ;;  %vm110_vm1 = vcmask 3072  }
  0x14   :  { %v30_v2 = vcombine.high %v26_v0, %v26_v0  ;;  %v35_v3 = vsel %vm34_vm0, %v26_v0, 0.0  ;;  %v31_v4 = vcombine.high %v27_v1, %v27_v1  ;;  %v40_v6 = vsel %vm34_vm0, %v27_v1, 0.0  ;;  %s205_s28 = smov [#allocation5]  }
  0x15   :  { %v204_v10 = vmov 839922192   ;;  %v54_v15 = vshrl.u32 %v53_v12, 7  ;;  %s118_s29 = sshll.u32 %s205_s28, 4  ;;  %s119_s29 = int_to_ptr.vmem [resolvable:$true] %s118_s29 }
  0x16   :  { %v36_v5 = vsel %vm34_vm0, %v30_v2, 0.0  ;;  %v41_v7 = vsel %vm34_vm0, %v31_v4, 0.0  ;;  %v51_v11 = vunpack.c.l.s4 %v204_v10  ;;  %s175_s30 = scalar_lea.vmem %s119_s29, 256  ;;  %p180_p9 = scmp.lt.s32.totalorder %s119_s29, %s119_s29 }
  0x17   :  { %v37_v8 = vadd.f32 %v36_v5, %v35_v3  ;;  %v42_v9 = vadd.f32 %v41_v7, %v40_v6  ;;  %p176_p8 = scmp.ne.s32.totalorder %s119_s29, %s175_s30  ;;  %p181_p10 = scmp.lt.s32.totalorder %s175_s30, %s175_s30 }
  0x18   :  { %v52_v14 = vunpack.c.0.s8 %v51_v11 }
  0x19   :  { %38 = vadd.xlane.f32.xlu0 %v37_v8  ;;  %p182_p11 = por %p181_p10, %p180_p9 }
  0x1a   :  { %v55_v19 = vsub.s32 %v52_v14, %v54_v15 }
  0x1b   :  { %p183_p12 = pnand %p182_p11, %p176_p8 }
  0x1d   :  { %43 = vadd.xlane.f32.xlu0 %v42_v9 }
  0xa6   :  { %v39_v13 = vpop.xlane.xlu0 %38 }
  0xa7   :  { %v45_v17 = vsel %vm34_vm0, %v39_v13, 0.0 }
  0xaa   :  { %v44_v16 = vpop.xlane.xlu0 %43 }
  0xab   :  { %v46_v18 = vsel %vm34_vm0, %v44_v16, 0.0 }
  0xac   :  { %v47_v20 = vadd.f32 %v46_v18, %v45_v17 }
  0xae   :  { %v48_v21 = vmul.f32 0.001953125, %v47_v20 }
  0xb0   :  { %v56_v22 = vrot.slane %v48_v21, %v55_v19  ;;  %v109_v23 = vsub.f32 0.0, %v48_v21 }
  0xb2   :  { %v59_v24 = vsub.f32 %v27_v1, %v56_v22  ;;  %111 = vst.msk [vmem:[%s278_s2] sm:$0xf] %vm110_vm1, %v109_v23  ;;  %v58_v25 = vsub.f32 %v26_v0, %v56_v22 }
  0xb4   :  { %v60_v26 = vmul.f32 %v58_v25, %v58_v25  ;;  %v61_v27 = vmul.f32 %v59_v24, %v59_v24 }
  0xb6   :  { %v64_v28 = vcombine.high %v60_v26, %v60_v26  ;;  %v65_v29 = vcombine.high %v61_v27, %v61_v27  ;;  %v68_v30 = vsel %vm34_vm0, %v60_v26, 0.0  ;;  %v73_v34 = vsel %vm34_vm0, %v61_v27, 0.0 }
  0xb8   :  { %v69_v31 = vsel %vm34_vm0, %v64_v28, 0.0  ;;  %v74_v33 = vsel %vm34_vm0, %v65_v29, 0.0 }
  0xb9   :  { %v70_v32 = vadd.f32 %v69_v31, %v68_v30  ;;  %v75_v35 = vadd.f32 %v74_v33, %v73_v34 }
  0xbb   :  { %71 = vadd.xlane.f32.xlu1 %v70_v32 }
  0xbf   :  { %76 = vadd.xlane.f32.xlu1 %v75_v35 }
 0x148   :  { %v72_v36 = vpop.xlane.xlu1 %71 }
 0x149   :  { %v78_v38 = vsel %vm34_vm0, %v72_v36, 0.0 }
 0x14c   :  { %v77_v37 = vpop.xlane.xlu1 %76 }
 0x14d   :  { %v79_v39 = vsel %vm34_vm0, %v77_v37, 0.0 }
 0x14e   :  { %v80_v40 = vadd.f32 %v79_v39, %v78_v38 }
 0x150   :  { %v81_v41 = vmul.f32 0.0019569471, %v80_v40 }
 0x152   :  { %145 = vrsqrt.f32 %v81_v41  ;;  %vm84_vm2 = vcmp.eq.f32.partialorder %v81_v41, inf  ;;  %v87_v44 = vand.u32 2147483648, %v81_v41  ;;  %vm86_vm3 = vcmp.eq.f32.partialorder %v81_v41, 0.0 }
 0x15c   :  { %v146_v42 = vpop.eup %145 }
 0x15d   :  { %v83_v43 = vmul.f32 %v146_v42, %v81_v41 }
 0x15f   :  { %v85_v45 = vsel %vm84_vm2, %v81_v41, %v83_v43 }
 0x160   :  { %v88_v46 = vsel %vm86_vm3, %v87_v44, %v85_v45 }
 0x161   :  { %v89_v47 = vadd.f32 1e-06, %v88_v46 }
 0x163   :  { %147 = vrcp.f32 %v89_v47 }
 0x16d   :  { %v148_v48 = vpop.eup %147 }
 0x16e   :  { %149 = vlog2.f32 %v148_v48 }
 0x178   :  { %v150_v49 = vpop.eup %149 }
 0x179   :  { %v93_v50 = vmul.f32 0.6931472, %v150_v49 }
 0x17b   :  { %v94_v51 = vmul.f32 1.442695, %v93_v50  ;;  %112 = vst.msk [vmem:[%s279_s3] sm:$0xf] %vm110_vm1, %v93_v50 }
 0x17d   :  { %151 = vpow2.f32 %v94_v51 }
 0x187   :  { %v152_v52 = vpop.eup %151 }
 0x188   :  { %v103_v53 = vrot.slane %v152_v52, %v55_v19 }
 0x18a   :  { %v105_v54 = vmul.f32 %v103_v53, %v58_v25  ;;  %v106_v55 = vmul.f32 %v103_v53, %v59_v24 }
 0x18c   :  { %107 = vst [vmem:[#allocation5] sm:$0xff] %v105_v54  ;;  %108 = vst [vmem:[#allocation5 + $0x8] sm:$0xff] %v106_v55 }
 0x18d   :  { %186 = shalt.err (!%p183_p12)
}
 0x18e   :  { %s187_s3 = scalar_lea.hbm %s277_s1, 256 }
 0x18f   :  { %p188_p13 = scmp.ne.s32.totalorder %s277_s1, %s187_s3  ;;  %p191_p0 = scmp.lt.u32.totalorder %s187_s3, %s277_s1 }
 0x191   :  { %p193_p1 = pnand %p191_p0, %p188_p13 }
 0x193   :  { %196 = shalt.err (!%p193_p1)
}
 0x194   :  { %124 = dma.vmem_to_hbm [thread:$0]  %s119_s29, 256, %s277_s1, [#allocation4], %s202_s22, %s202_s22, %s203_s23  }
 0x195   :  { %199 = dma.done.wait [#allocation4], 256  }
 0x196   :  { %200 = vsyncadd [#allocation4], 4294967040 }
 0x197   :  { %136 = vsyncpa [#allocation3], 1 }
 0x198   :  { %137 = vsyncpa [#allocation4], 1 }

</bundles_post_ra>
